<compile_context>
chip_gen: v5e
topology: v5e:2x2
jax: 0.10.0
libtpu: 0.0.40
codegen_flags: <defaults>
</compile_context>

<pallas_src>
import jax
import jax.numpy as jnp
from jax.experimental import pallas as pl
from jax.experimental.pallas import tpu as pltpu


def gaussian_prior_kernel(mean_ref, std_ref, out_ref):
    """Pack the prior's parameters into one lane-dense slab.

    mean_ref: (1, M)   prior loc   (zeros)
    std_ref : (1, M)   prior scale (ones)
    out_ref : (1, 2M)  [loc | scale] — single unmasked 128-lane store
    """
    out_ref[...] = jnp.concatenate([mean_ref[...], std_ref[...]], axis=-1)


def gaussian_prior_forward(mean, std):
    """Returns (loc, scale) parameterizing Independent(Normal(loc, scale), 1).

    mean, std: (M,) float32 parameter vectors (zeros / ones in the module).
    """
    M = mean.shape[-1]
    mean2d = mean.reshape(1, M)
    std2d = std.reshape(1, M)

    packed = pl.pallas_call(
        gaussian_prior_kernel,
        out_shape=jax.ShapeDtypeStruct((1, 2 * M), jnp.float32),
        grid_spec=pl.GridSpec(
            grid=(1,),
            in_specs=[
                pl.BlockSpec((1, M), lambda i: (0, 0)),
                pl.BlockSpec((1, M), lambda i: (0, 0)),
            ],
            out_specs=pl.BlockSpec((1, 2 * M), lambda i: (0, 0)),
        ),
        compiler_params=pltpu.CompilerParams(
            dimension_semantics=("arbitrary",)),
        cost_estimate=pl.CostEstimate(
            flops=0, transcendentals=0, bytes_accessed=4 * 4 * M),
    )(mean2d, std2d)

    # Chunk the lane-dense slab back into (loc, scale) in the wrapper
    # (fuses into surrounding XLA for free).
    loc = packed[0, :M]
    scale = packed[0, M:]
    return loc, scale


def make_gaussian_prior_params(M, dtype=jnp.float32):
    """Matches GaussianPrior.__init__: mean = zeros(M), std = ones(M)."""
    return jnp.zeros((M,), dtype), jnp.ones((M,), dtype)


def reference_forward(mean, std):
    """Pure-JAX reference: the prior distribution's (loc, scale)."""
    return mean, std


if __name__ == "__main__":
    # Small shape consistent with the module: only the latent dimension M.
    M = 64

    # GaussianPrior has no data inputs; its parameters are fixed by
    # construction (zeros / ones), exactly as in the PyTorch module.
    mean, std = make_gaussian_prior_params(M)

    loc, scale = jax.jit(gaussian_prior_forward)(mean, std)
    jax.block_until_ready((loc, scale))

    loc_ref, scale_ref = reference_forward(mean, std)
    assert loc.shape == (M,) and scale.shape == (M,)
    assert jnp.allclose(loc, loc_ref)
    assert jnp.allclose(scale, scale_ref)
    assert bool(jnp.all(scale > 0))  # valid Normal scale

    # Deterministic sample from the resulting Independent-Normal as a sanity
    # check that (loc, scale) define a usable distribution.
    key = jax.random.PRNGKey(0)
    z = loc + scale * jax.random.normal(key, (M,), dtype=jnp.float32)
    assert bool(jnp.all(jnp.isfinite(z)))

    print("KERNEL_OK")
</pallas_src>

<mosaic_0001>
module attributes {stable_mosaic.version = 11 : i64} {
  func.func @gaussian_prior_kernel(%arg0: i32, %arg1: memref<1x64xf32, #tpu.memory_space<vmem>>, %arg2: memref<1x64xf32, #tpu.memory_space<vmem>>, %arg3: memref<1x128xf32, #tpu.memory_space<vmem>>) attributes {dimension_semantics = [#tpu.dimension_semantics<arbitrary>], iteration_bounds = array<i64: 1>, scalar_prefetch = 0 : i64, scratch_operands = 0 : i64, tpu.core_type = #tpu.core_type<tc>, window_params = [{pipeline_mode = #tpu.pipeline_mode<synchronous>, transform_indices = @transform_0, window_bounds = array<i64: 1, 64>}, {pipeline_mode = #tpu.pipeline_mode<synchronous>, transform_indices = @transform_1, window_bounds = array<i64: 1, 64>}, {pipeline_mode = #tpu.pipeline_mode<synchronous>, transform_indices = @transform_2, window_bounds = array<i64: 1, 128>}]} {
    %c0 = arith.constant 0 : index
    %c0_0 = arith.constant 0 : index
    %0 = vector.load %arg1[%c0, %c0_0] : memref<1x64xf32, #tpu.memory_space<vmem>>, vector<1x64xf32>
    %c0_1 = arith.constant 0 : index
    %c0_2 = arith.constant 0 : index
    %1 = vector.load %arg2[%c0_1, %c0_2] : memref<1x64xf32, #tpu.memory_space<vmem>>, vector<1x64xf32>
    %2 = tpu.concatenate %0, %1 in 1 : vector<1x64xf32>, vector<1x64xf32> -> vector<1x128xf32>
    %c0_3 = arith.constant 0 : index
    %c0_4 = arith.constant 0 : index
    %3 = vector.load %arg3[%c0_3, %c0_4] : memref<1x128xf32, #tpu.memory_space<vmem>>, vector<1x128xf32>
    tpu.vector_store %arg3[%c0_3, %c0_4], %2 {strides = array<i32>} : memref<1x128xf32, #tpu.memory_space<vmem>>, vector<1x128xf32>,
    return
  }
  func.func @transform_0(%arg0: i32) -> (i32, i32) {
    %c0_i32 = arith.constant 0 : i32
    %c0_i32_0 = arith.constant 0 : i32
    %c0_i32_1 = arith.constant 0 : i32
    return %c0_i32, %c0_i32_0 : i32, i32
  }
  func.func @transform_1(%arg0: i32) -> (i32, i32) {
    %c0_i32 = arith.constant 0 : i32
    %c0_i32_0 = arith.constant 0 : i32
    %c0_i32_1 = arith.constant 0 : i32
    return %c0_i32, %c0_i32_0 : i32, i32
  }
  func.func @transform_2(%arg0: i32) -> (i32, i32) {
    %c0_i32 = arith.constant 0 : i32
    %c0_i32_0 = arith.constant 0 : i32
    %c0_i32_1 = arith.constant 0 : i32
    return %c0_i32, %c0_i32_0 : i32, i32
  }
}

</mosaic_0001>

<bundles_post_ra>
// kernel: gaussian_prior_forward.1
= control target key start
LH: loop header
LB: loop body
LE: loop exit
PB: predicated region body
PF: predicated region fallthrough
CT: control target
= control target key end

     0   :  { %s27_s11 = smov 64   ;;  %vm18_vm0 = vcmask 523264   ;;  %s52_s1 = inlined_call_operand.vmem [shape: f32[1,64], index: 1, kind: input, shape index: {}]   ;;  %s53_s0 = inlined_call_operand.vmem [shape: f32[1,64], index: 0, kind: input, shape index: {}]   ;;  %s54_s2 = inlined_call_operand.vmem [shape: f32[1,128], index: 2, kind: output, shape index: {}]  }
   0x1   :  { %v26_v0 = vld [vmem:[%s52_s1] ss:$0 sm:$0xff] }
   0x2   :  { %15 = vrot.lane.b32.xlu0 %v26_v0, %s27_s11  ;;  %v11_v1 = vld [vmem:[%s53_s0] sm:$0x1] }
  0x74   :  { %v16_v2 = vpop.permute.xlu0 %15 }
  0x75   :  { %v19_v3 = vsel %vm18_vm0, %v11_v1, %v16_v2 }
  0x76   :  { %20 = vst [vmem:[%s54_s2] sm:$0x1] %v19_v3 }

</bundles_post_ra>
